<compile_context>
chip_gen: v5e
topology: v5e:2x2
jax: 0.10.0
libtpu: 0.0.40
codegen_flags: <defaults>
</compile_context>

<pallas_src>
import numpy as np
import jax
import jax.numpy as jnp
from jax.experimental import pallas as pl
from jax.experimental.pallas import tpu as pltpu


def _hardswish(x):
    return x * jnp.clip(x + 3.0, 0.0, 6.0) * (1.0 / 6.0)


def _hardsigmoid(x):
    return jnp.clip(x + 3.0, 0.0, 6.0) * (1.0 / 6.0)


# ------------------------------ fused kernel ---------------------------------

def _spatial_se_kernel(x_ref, w1_ref, b1_ref, w2_ref, b2_ref, m_ref, b3_ref,
                       o_ref):
    """One batch element per grid step.

    x_ref : (1, C, HW)  input; channels on sublanes, HW (lane-dense) on lanes
    w1_ref: (mid, C)    1x1 conv #1 weight
    b1_ref: (mid, 1)    1x1 conv #1 bias
    w2_ref: (mid, 1)    1x1 conv #2 weight (stored as a column)
    b2_ref: (1, 1)      1x1 conv #2 bias
    m_ref : (HW, HW)    fused [res x res stride-res conv + nearest upsample]
    b3_ref: (1, 1)      strided conv bias
    o_ref : (1, C, HW)  output
    """
    x = x_ref[0]                                                    # (C, HW)

    # 1x1 conv (C -> mid) + Hardswish; HW on lanes -> lane-dense MXU matmul.
    y = jnp.dot(w1_ref[...], x, preferred_element_type=jnp.float32)
    y = _hardswish(y + b1_ref[...])                                 # (mid, HW)

    # 1x1 conv (mid -> 1): mid is tiny, do it on the VPU (mul + sublane sum).
    z = jnp.sum(w2_ref[...] * y, axis=0, keepdims=True) + b2_ref[...]  # (1, HW)

    # res x res / stride-res conv + nearest upsample as one (HW, HW) operator.
    s = jnp.dot(z, m_ref[...], preferred_element_type=jnp.float32)
    s = _hardsigmoid(s + b3_ref[...])                               # (1, HW)

    # Re-weight: broadcast the spatial gate over the channel (sublane) axis.
    o_ref[0] = x * s


def spatial_se_forward(x, params):
    """x: (N, C, H, W) float32 (NCHW, as in the PyTorch module)."""
    N, C, H, W = x.shape
    HW = H * W
    mid = params['w1'].shape[0]
    x2 = x.reshape(N, C, HW)
    out = pl.pallas_call(
        _spatial_se_kernel,
        out_shape=jax.ShapeDtypeStruct((N, C, HW), jnp.float32),
        grid=(N,),
        in_specs=[
            pl.BlockSpec((1, C, HW), lambda n: (n, 0, 0)),
            pl.BlockSpec((mid, C), lambda n: (0, 0)),
            pl.BlockSpec((mid, 1), lambda n: (0, 0)),
            pl.BlockSpec((mid, 1), lambda n: (0, 0)),
            pl.BlockSpec((1, 1), lambda n: (0, 0)),
            pl.BlockSpec((HW, HW), lambda n: (0, 0)),
            pl.BlockSpec((1, 1), lambda n: (0, 0)),
        ],
        out_specs=pl.BlockSpec((1, C, HW), lambda n: (n, 0, 0)),
        compiler_params=pltpu.CompilerParams(
            dimension_semantics=("parallel",)),
    )(x2, params['w1'], params['b1'], params['w2'], params['b2'],
      params['m'], params['b3'])
    return out.reshape(N, C, H, W)


# ------------- host-side constant: fused conv_res + nearest upsample ---------

def _build_scale_operator(k, H, W, res):
    """M such that (z_flat[1,HW]) @ M == up_nearest(conv_{res,stride=res}(z)).

    M[p, i] = k[a, b] with i = ih*W + iw, bi = ih//res, bj = iw//res,
                            p = (bi*res + a)*W + (bj*res + b).
    """
    HW = H * W
    M = np.zeros((HW, HW), dtype=np.float32)
    for ih in range(H):
        bi = ih // res
        for iw in range(W):
            bj = iw // res
            i = ih * W + iw
            for a in range(res):
                for b in range(res):
                    p = (bi * res + a) * W + (bj * res + b)
                    M[p, i] = k[a, b]
    return jnp.asarray(M)


# ------------------------------ parameters ------------------------------------

def init_params(key, C, H, W, res):
    mid = C // 16
    k1, k2, k3, k4, k5, k6 = jax.random.split(key, 6)
    w1 = jax.random.normal(k1, (mid, C), jnp.float32) / np.sqrt(C)
    b1 = 0.1 * jax.random.normal(k2, (mid, 1), jnp.float32)
    w2 = jax.random.normal(k3, (mid, 1), jnp.float32) / np.sqrt(mid)
    b2 = 0.1 * jax.random.normal(k4, (1, 1), jnp.float32)
    kconv = jax.random.normal(k5, (res, res), jnp.float32) / res
    b3 = 0.1 * jax.random.normal(k6, (1, 1), jnp.float32)
    m = _build_scale_operator(np.asarray(jax.device_get(kconv)), H, W, res)
    return dict(w1=w1, b1=b1, w2=w2, b2=b2, kconv=kconv, b3=b3, m=m)


# --------------------------- pure-JAX reference --------------------------------

def spatial_se_reference(x, p, res):
    """Elementwise-only (no MXU) reference for numerical checking."""
    N, C, H, W = x.shape
    mid = p['w1'].shape[0]
    # conv1 1x1 + hardswish
    y = (p['w1'].reshape(1, mid, C, 1, 1) * x[:, None]).sum(axis=2)
    y = y + p['b1'].reshape(1, mid, 1, 1)
    y = y * jnp.clip(y + 3.0, 0.0, 6.0) / 6.0
    # conv2 1x1 -> 1 channel
    z = (p['w2'].reshape(1, mid, 1, 1) * y).sum(axis=1, keepdims=True)
    z = z + p['b2'].reshape(1, 1, 1, 1)                       # (N,1,H,W)
    # res x res conv, stride res (blockwise weighted sum)
    zb = z.reshape(N, 1, H // res, res, W // res, res)
    pooled = (zb * p['kconv'].reshape(1, 1, 1, res, 1, res)).sum(axis=(3, 5))
    pooled = pooled + p['b3'].reshape(1, 1, 1, 1)
    s = jnp.clip(pooled + 3.0, 0.0, 6.0) / 6.0
    # nearest-neighbour upsample by res
    s = jnp.repeat(jnp.repeat(s, res, axis=2), res, axis=3)
    return x * s


# ----------------------------------- main --------------------------------------

if __name__ == "__main__":
    N, C, H, W = 2, 32, 16, 16       # in_channels=32 -> mid = 32 // 16 = 2
    res = 4                          # res must divide H and W
    assert C // 16 >= 1 and H % res == 0 and W % res == 0

    key = jax.random.PRNGKey(0)
    kx, kp = jax.random.split(key)
    x = jax.random.normal(kx, (N, C, H, W), jnp.float32)
    params = init_params(kp, C, H, W, res)

    out = spatial_se_forward(x, params)
    jax.block_until_ready(out)
    assert out.shape == (N, C, H, W)

    ref = spatial_se_reference(x, params, res)
    np.testing.assert_allclose(np.asarray(out), np.asarray(ref),
                               rtol=5e-2, atol=5e-2)
    print("KERNEL_OK")
</pallas_src>

<mosaic_0001>
module attributes {stable_mosaic.version = 11 : i64} {
  func.func @_spatial_se_kernel(%arg0: i32, %arg1: memref<1x32x256xf32, #tpu.memory_space<vmem>>, %arg2: memref<2x32xf32, #tpu.memory_space<vmem>>, %arg3: memref<2x1xf32, #tpu.memory_space<vmem>>, %arg4: memref<2x1xf32, #tpu.memory_space<vmem>>, %arg5: memref<1x1xf32, #tpu.memory_space<vmem>>, %arg6: memref<256x256xf32, #tpu.memory_space<vmem>>, %arg7: memref<1x1xf32, #tpu.memory_space<vmem>>, %arg8: memref<1x32x256xf32, #tpu.memory_space<vmem>>) attributes {dimension_semantics = [#tpu.dimension_semantics<parallel>], iteration_bounds = array<i64: 2>, scalar_prefetch = 0 : i64, scratch_operands = 0 : i64, tpu.core_type = #tpu.core_type<tc>, window_params = [{transform_indices = @transform_0, window_bounds = array<i64: 1, 32, 256>}, {pipeline_mode = #tpu.pipeline_mode<synchronous>, transform_indices = @transform_1, window_bounds = array<i64: 2, 32>}, {pipeline_mode = #tpu.pipeline_mode<synchronous>, transform_indices = @transform_2, window_bounds = array<i64: 2, 1>}, {pipeline_mode = #tpu.pipeline_mode<synchronous>, transform_indices = @transform_3, window_bounds = array<i64: 2, 1>}, {pipeline_mode = #tpu.pipeline_mode<synchronous>, transform_indices = @transform_4, window_bounds = array<i64: 1, 1>}, {pipeline_mode = #tpu.pipeline_mode<synchronous>, transform_indices = @transform_5, window_bounds = array<i64: 256, 256>}, {pipeline_mode = #tpu.pipeline_mode<synchronous>, transform_indices = @transform_6, window_bounds = array<i64: 1, 1>}, {transform_indices = @transform_7, window_bounds = array<i64: 1, 32, 256>}]} {
    %c0 = arith.constant 0 : index
    %c0_0 = arith.constant 0 : index
    %c0_1 = arith.constant 0 : index
    %0 = vector.load %arg1[%c0, %c0_0, %c0_1] : memref<1x32x256xf32, #tpu.memory_space<vmem>>, vector<1x32x256xf32>
    %1 = vector.shape_cast %0 : vector<1x32x256xf32> to vector<32x256xf32>
    %c0_2 = arith.constant 0 : index
    %c0_3 = arith.constant 0 : index
    %2 = vector.load %arg2[%c0_2, %c0_3] : memref<2x32xf32, #tpu.memory_space<vmem>>, vector<2x32xf32>
    %cst = arith.constant dense<0.000000e+00> : vector<2x256xf32>
    %3 = tpu.matmul %2, %1, %cst {dimension_numbers = #tpu.dot_dimension_numbers<[1], [0], [0], [1], [0, 0, 1, 1], [], []>} : vector<2x32xf32>, vector<32x256xf32>, vector<2x256xf32> -> vector<2x256xf32>
    %c0_4 = arith.constant 0 : index
    %c0_5 = arith.constant 0 : index
    %4 = vector.load %arg3[%c0_4, %c0_5] : memref<2x1xf32, #tpu.memory_space<vmem>>, vector<2x1xf32>
    %5 = vector.broadcast %4 : vector<2x1xf32> to vector<2x256xf32>
    %6 = arith.addf %3, %5 : vector<2x256xf32>
    %cst_6 = arith.constant 3.000000e+00 : f32
    %7 = vector.broadcast %cst_6 : f32 to vector<2x256xf32>
    %8 = arith.addf %6, %7 : vector<2x256xf32>
    %cst_7 = arith.constant 0.000000e+00 : f32
    %cst_8 = arith.constant 6.000000e+00 : f32
    %9 = vector.broadcast %cst_7 : f32 to vector<2x256xf32>
    %10 = arith.maximumf %9, %8 : vector<2x256xf32>
    %11 = vector.broadcast %cst_8 : f32 to vector<2x256xf32>
    %12 = arith.minimumf %11, %10 : vector<2x256xf32>
    %13 = arith.mulf %6, %12 : vector<2x256xf32>
    %cst_9 = arith.constant 0.166666672 : f32
    %14 = vector.broadcast %cst_9 : f32 to vector<2x256xf32>
    %15 = arith.mulf %13, %14 : vector<2x256xf32>
    %c0_10 = arith.constant 0 : index
    %c0_11 = arith.constant 0 : index
    %16 = vector.load %arg4[%c0_10, %c0_11] : memref<2x1xf32, #tpu.memory_space<vmem>>, vector<2x1xf32>
    %17 = vector.broadcast %16 : vector<2x1xf32> to vector<2x256xf32>
    %18 = arith.mulf %17, %15 : vector<2x256xf32>
    %cst_12 = arith.constant dense<0.000000e+00> : vector<256xf32>
    %19 = vector.multi_reduction <add>, %18, %cst_12 [0] : vector<2x256xf32> to vector<256xf32>
    %20 = vector.shape_cast %19 : vector<256xf32> to vector<1x256xf32>
    %c0_13 = arith.constant 0 : index
    %c0_14 = arith.constant 0 : index
    %21 = vector.load %arg5[%c0_13, %c0_14] : memref<1x1xf32, #tpu.memory_space<vmem>>, vector<1x1xf32>
    %22 = vector.broadcast %21 : vector<1x1xf32> to vector<1x256xf32>
    %23 = arith.addf %20, %22 : vector<1x256xf32>
    %c0_15 = arith.constant 0 : index
    %c0_16 = arith.constant 0 : index
    %24 = vector.load %arg6[%c0_15, %c0_16] : memref<256x256xf32, #tpu.memory_space<vmem>>, vector<256x256xf32>
    %cst_17 = arith.constant dense<0.000000e+00> : vector<1x256xf32>
    %25 = tpu.matmul %23, %24, %cst_17 {dimension_numbers = #tpu.dot_dimension_numbers<[1], [0], [0], [1], [0, 0, 1, 1], [], []>} : vector<1x256xf32>, vector<256x256xf32>, vector<1x256xf32> -> vector<1x256xf32>
    %c0_18 = arith.constant 0 : index
    %c0_19 = arith.constant 0 : index
    %26 = vector.load %arg7[%c0_18, %c0_19] : memref<1x1xf32, #tpu.memory_space<vmem>>, vector<1x1xf32>
    %27 = vector.broadcast %26 : vector<1x1xf32> to vector<1x256xf32>
    %28 = arith.addf %25, %27 : vector<1x256xf32>
    %cst_20 = arith.constant 3.000000e+00 : f32
    %29 = vector.broadcast %cst_20 : f32 to vector<1x256xf32>
    %30 = arith.addf %28, %29 : vector<1x256xf32>
    %cst_21 = arith.constant 0.000000e+00 : f32
    %cst_22 = arith.constant 6.000000e+00 : f32
    %31 = vector.broadcast %cst_21 : f32 to vector<1x256xf32>
    %32 = arith.maximumf %31, %30 : vector<1x256xf32>
    %33 = vector.broadcast %cst_22 : f32 to vector<1x256xf32>
    %34 = arith.minimumf %33, %32 : vector<1x256xf32>
    %cst_23 = arith.constant 0.166666672 : f32
    %35 = vector.broadcast %cst_23 : f32 to vector<1x256xf32>
    %36 = arith.mulf %34, %35 : vector<1x256xf32>
    %37 = vector.broadcast %36 : vector<1x256xf32> to vector<32x256xf32>
    %38 = arith.mulf %1, %37 : vector<32x256xf32>
    %c0_24 = arith.constant 0 : index
    %c0_25 = arith.constant 0 : index
    %c0_26 = arith.constant 0 : index
    %39 = vector.load %arg8[%c0_24, %c0_25, %c0_26] : memref<1x32x256xf32, #tpu.memory_space<vmem>>, vector<1x32x256xf32>
    %40 = vector.shape_cast %39 : vector<1x32x256xf32> to vector<32x256xf32>
    %41 = vector.shape_cast %38 : vector<32x256xf32> to vector<1x32x256xf32>
    tpu.vector_store %arg8[%c0_24, %c0_25, %c0_26], %41 {strides = array<i32>} : memref<1x32x256xf32, #tpu.memory_space<vmem>>, vector<1x32x256xf32>,
    return
  }
  func.func @transform_0(%arg0: i32) -> (i32, i32, i32) {
    %c0_i32 = arith.constant 0 : i32
    %c0_i32_0 = arith.constant 0 : i32
    %c0_i32_1 = arith.constant 0 : i32
    return %arg0, %c0_i32, %c0_i32_0 : i32, i32, i32
  }
  func.func @transform_1(%arg0: i32) -> (i32, i32) {
    %c0_i32 = arith.constant 0 : i32
    %c0_i32_0 = arith.constant 0 : i32
    %c0_i32_1 = arith.constant 0 : i32
    return %c0_i32, %c0_i32_0 : i32, i32
  }
  func.func @transform_2(%arg0: i32) -> (i32, i32) {
    %c0_i32 = arith.constant 0 : i32
    %c0_i32_0 = arith.constant 0 : i32
    %c0_i32_1 = arith.constant 0 : i32
    return %c0_i32, %c0_i32_0 : i32, i32
  }
  func.func @transform_3(%arg0: i32) -> (i32, i32) {
    %c0_i32 = arith.constant 0 : i32
    %c0_i32_0 = arith.constant 0 : i32
    %c0_i32_1 = arith.constant 0 : i32
    return %c0_i32, %c0_i32_0 : i32, i32
  }
  func.func @transform_4(%arg0: i32) -> (i32, i32) {
    %c0_i32 = arith.constant 0 : i32
    %c0_i32_0 = arith.constant 0 : i32
    %c0_i32_1 = arith.constant 0 : i32
    return %c0_i32, %c0_i32_0 : i32, i32
  }
  func.func @transform_5(%arg0: i32) -> (i32, i32) {
    %c0_i32 = arith.constant 0 : i32
    %c0_i32_0 = arith.constant 0 : i32
    %c0_i32_1 = arith.constant 0 : i32
    return %c0_i32, %c0_i32_0 : i32, i32
  }
  func.func @transform_6(%arg0: i32) -> (i32, i32) {
    %c0_i32 = arith.constant 0 : i32
    %c0_i32_0 = arith.constant 0 : i32
    %c0_i32_1 = arith.constant 0 : i32
    return %c0_i32, %c0_i32_0 : i32, i32
  }
  func.func @transform_7(%arg0: i32) -> (i32, i32, i32) {
    %c0_i32 = arith.constant 0 : i32
    %c0_i32_0 = arith.constant 0 : i32
    %c0_i32_1 = arith.constant 0 : i32
    return %arg0, %c0_i32, %c0_i32_0 : i32, i32, i32
  }
}

</mosaic_0001>

<bundles_post_ra>
// kernel: tpu_custom_call.1
= control target key start
LH: loop header
LB: loop body
LE: loop exit
PB: predicated region body
PF: predicated region fallthrough
CT: control target
= control target key end

     0   :  { %s1154_s0 = inlined_call_operand.hbm [shape: f32[2,32,256], index: 0, kind: input, shape index: {}]   ;;  %s1155_s1 = inlined_call_operand.vmem [shape: f32[2,32], index: 1, kind: input, shape index: {}]   ;;  %s1156_s2 = inlined_call_operand.vmem [shape: f32[2,1], index: 2, kind: input, shape index: {}]   ;;  %s1157_s3 = inlined_call_operand.vmem [shape: f32[2,1], index: 3, kind: input, shape index: {}]   ;;  %s1158_s4 = inlined_call_operand.<no memory space> [shape: f32[1,1], index: 4, kind: input, shape index: {}]   ;;  %s1159_s5 = inlined_call_operand.hbm [shape: f32[256,256], index: 5, kind: input, shape index: {}]   ;;  %s1160_s7 = inlined_call_operand.hbm [shape: f32[2,32,256], index: 7, kind: output, shape index: {}]   ;;  %s1161_s6 = inlined_call_operand.<no memory space> [shape: f32[1,1], index: 6, kind: input, shape index: {}]  }
   0x1   :  { %v12_v0 = vstv %s1158_s4  ;;  %v14_v1 = vstv %s1161_s6 }
   0x2   :  { %13 = vst [vmem:[#allocation2] sm:$0x1] %v12_v0 }
   0x3   :  { %15 = vst [vmem:[#allocation3] sm:$0x1] %v14_v1 }
   0x4   :  { %16 = vsyncpa [#allocation5], 0 }
   0x5   :  { %18 = vsyncpa [#allocation5 + $0x1], 0 }
   0x6   :  { %19 = vsyncpa [#allocation8], 0 }
   0x7   :  { %20 = vsyncpa [#allocation6], 0 }
   0x8   :  { %22 = vsyncpa [#allocation6 + $0x1], 0  ;;  %s965_s28 = smov 0   ;;  %s967_s29 = smov 0  }
   0x9   :  { %s969_s30 = smov 0   ;;  %s971_s8 = smov 0  }
   0xa LB: > { %s986_s4 = sadd.s32 4294967295, %s911_s8   ;;  %s697_s6 = sadd.s32 4294967294, %s911_s8   ;;  %s911_s8 = sphi %s971_s8, %s1173_s8   ;;  %s907_s30 = sphi %s969_s30, %s1172_s30   ;;  %s903_s29 = sphi %s967_s29, %s1171_s29   ;;  %s899_s28 = sphi %s965_s28, %s1170_s28  }
   0xb   : > { %p48_p0 = scmp.ne.s32.totalorder %s903_s29, %s899_s28  ;;  %p49_p1 = scmp.eq.s32.totalorder %s986_s4, 0 }
   0xc   : > { %p198_p2 = scmp.eq.s32.totalorder %s986_s4, 1  ;;  %p204_p3 = scmp.eq.s32.totalorder %s697_s6, 1 }
   0xd   : > { %p995_p4 = por %p49_p1, %p48_p0  ;;  %p698_p5 = scmp.ge.s32.totalorder %s911_s8, 1 }
   0xe   : > { %p1000_p6 = por %p204_p3, %p48_p0  ;;  %p211_p7 = scmp.lt.s32.totalorder %s911_s8, 3 }
   0xf   : > { %s234_s13 = sshll.u32 %s1159_s5, 4  ;;  %s913_s15 = smov [#allocation7]   ;;  %s235_s13 = int_to_ptr.hbm [resolvable:$true] %s234_s13 }
  0x10   : > { %p1008_p8 = pnand %p698_p5, %p211_p7  ;;  %s236_s16 = sshll.u32 %s913_s15, 4  ;;  %s237_s16 = int_to_ptr.vmem [resolvable:$true] %s236_s16 }
  0x11   : > { %s1018_s17 = sadd.s32 1, %s911_s8   ;;  %s1162_s18 = smov 256  }
  0x12   : > { %p725_p9 = pneg %p1008_p8  ;;  %s915_s19 = smov 16  }
  0x13   : > { %s32_s20 = ssub.s32 %s911_s8, %s1018_s17  ;;  %s35_s21 = sadd.s32 1, %s907_s30 }
  0x14   : > { %p726_p10 = pnand %p725_p9, %p49_p1  ;;  %p33_p12 = scmp.eq.s32.totalorder %s32_s20, 0 }
  0x15   : > { %p42_p13 = scmp.ne.s32.totalorder %s907_s30, %s903_s29  ;;  %p43_p0 = scmp.eq.s32.totalorder %s911_s8, 0 }
  0x16   : > { %728 = dma.hbm_to_vmem [thread:$0]  (!%p726_p10), %s235_s13, 8192, %s237_s16, [#allocation8], %s1162_s18, %s1162_s18, %s915_s19  }
  0x17   : > { %s1030_s22 = scalar_select %p33_p12, %s907_s30, %s35_s21  }
  0x18   : > { %p1034_p3 = por %p198_p2, %p42_p13  ;;  %p738_p5 = scmp.lt.s32.totalorder %s911_s8, 2 }
  0x19   : > { %s253_s24 = sand.u32 1, %s907_s30   ;;  %s715_s25 = sshll.u32 %s911_s8, 6 }
  0x1a   : > { %p44_p7 = por %p43_p0, %p42_p13  ;;  %s701_s26 = sshll.u32 %s253_s24, 6 }
  0x1b   : > { %s262_s11 = scalar_lea.hbm %s1154_s0, %s715_s25  ;;  %s257_s13 = scalar_lea.vmem [#allocation4], %s701_s26 }
  0x1c   : > { %s263_s12 = sshll.u32 %s262_s11, 4  ;;  %s265_s15 = sshll.u32 %s257_s13, 4  ;;  %s264_s12 = int_to_ptr.hbm [resolvable:$true] %s263_s12  ;;  %s266_s15 = int_to_ptr.vmem [resolvable:$true] %s265_s15 }
  0x1d   : > { %p1044_p9 = pnand %p738_p5, %p44_p7  ;;  %s254_s20 = scalar_lea.sflag [#allocation5], %s253_s24 }
  0x1e   : > { %s811_s21 = sshra.s32 %s264_s12, 4  ;;  %s818_s26 = scalar_lea.hbm %s1154_s0, 128  ;;  %s812_s21 = int_to_ptr.hbm [resolvable:$true] %s811_s21 }
  0x1f   : > { %s813_s18 = scalar_lea.hbm %s812_s21, 64  ;;  %p815_p10 = pneg %p1044_p9 }
  0x20   : > { %p814_p2 = scmp.ne.s32.totalorder %s812_s21, %s813_s18  ;;  %p819_p0 = scmp.lt.s32.totalorder %s812_s21, %s1154_s0 }
  0x21   : > { %p820_p5 = scmp.lt.s32.totalorder %s818_s26, %s813_s18 }
  0x22   : > { %p816_p12 = pnand %p815_p10, %p814_p2 }
  0x23   : > { %p821_p7 = por %p820_p5, %p819_p0 }
  0x24   : > { %p817_p13 = pneg %p816_p12 }
  0x26   : > { %p822_p11 = pnand %p821_p7, %p817_p13 }
  0x28   : > { %825 = shalt.err (!%p822_p11)
}
  0x29   : > { %s1168_s24 = smov 256   ;;  %277 = sbr.rel (%p1008_p8) target bundleno = 368 (0x170), region = 48 }
  0x2a   : > { %732 = dma.hbm_to_vmem [thread:$0]  (!%p1044_p9), %s264_s12, 1024, %s266_s15, %s254_s20, %s1168_s24, %s1168_s24, %s915_s19  }
  0x2b   : > { %s1064_s13 = sand.u32 (!%p1008_p8), 1, %s903_s29  }
  0x2c   : > { %s705_s18 = sshll.u32 (!%p1008_p8), %s1064_s13, 6  ;;  %s280_s21 = scalar_lea.sflag (!%p1008_p8), [#allocation5], %s1064_s13 }
  0x2d   : > { %s283_s25 = scalar_lea.vmem (!%p1008_p8), [#allocation4], %s705_s18 }
  0x2e   : > { %886 = dma.done.wait (%p995_p4), %s280_s21, 1024  }
  0x2f   : > { %888 = vsyncadd (%p995_p4), %s280_s21, 4294966272 }
  0x30   : > { %890 = dma.done.wait (%p49_p1), [#allocation8], 8192  }
  0x31   : > { %892 = vsyncadd (%p49_p1), [#allocation8], 4294959104  ;;  %v916_v2 = vmov 0   ;;  %v1078_v3 = vld [vmem:[%s283_s25 + $0x30] sm:$0xff]  ;;  %v1080_v4 = vld [vmem:[%s283_s25 + $0x38] sm:$0xff]  ;;  %vm335_vm0 = vcmask 261120  }
  0x32   : > { %779 = vset.pattern.permute.xlu0 %v916_v2  ;;  %780 = vset.pattern.permute.xlu1 %v916_v2  ;;  %v1082_v5 = vld [vmem:[%s283_s25 + $0x20] sm:$0xff]  ;;  %v1086_v6 = vld [vmem:[%s283_s25 + $0x28] sm:$0xff]  ;;  %v1088_v7 = vld [vmem:[%s283_s25 + $0x10] sm:$0xff]  ;;  %vm397_vm1 = vcmask 1041408   ;;  %s716_s20 = sshll.u32 %s986_s4, 6  ;;  %s319_s11 = scalar_lea.vmem [#allocation9], %s705_s18 }
  0x33   : > { %351 = vmatpush.msra.mxu0 %v1078_v3  ;;  %371 = vmatpush.msra.mxu1 %v1080_v4  ;;  %v1090_v8 = vld [vmem:[%s283_s25 + $0x18] sm:$0xff]  ;;  %v1097_v11 = vld [vmem:[%s283_s25] sm:$0xff]  ;;  %v1099_v12 = vld [vmem:[%s283_s25 + $0x8] sm:$0xff]  ;;  %s610_s6 = scalar_lea.hbm %s1160_s7, %s716_s20  ;;  %s611_s4 = sshll.u32 %s319_s11, 4  ;;  %s612_s4 = int_to_ptr.vmem [resolvable:$true] %s611_s4 }
  0x34   : > { %v329_v9 = vld [vmem:[%s1156_s2] sm:$0x3]  ;;  %v451_v16 = vld [vmem:[#allocation7 + $0xf0] sm:$0xff]  ;;  %v449_v20 = vld [vmem:[#allocation7 + $0xe0] sm:$0xff]  ;;  %s613_s24 = sshll.u32 %s610_s6, 4  ;;  %s599_s18 = scalar_lea.sflag [#allocation6], %s1064_s13  ;;  %s614_s24 = int_to_ptr.hbm [resolvable:$true] %s613_s24 }
  0x35   : > { %352 = vmatpush.msra.mxu0 %v1082_v5  ;;  %372 = vmatpush.msra.mxu1 %v1086_v6  ;;  %v412_v10 = vld [vmem:[#allocation2] sm:$0x1]  ;;  %v485_v15 = vld [vmem:[#allocation3] sm:$0x1]  ;;  %v483_v17 = vld [vmem:[#allocation7 + $0x1f0] sm:$0xff]  ;;  %s855_s21 = sshra.s32 %s614_s24, 4  ;;  %s856_s21 = int_to_ptr.hbm [resolvable:$true] %s855_s21 }
  0x36   : > { %332 = vperm.xlu0 %779, %v329_v9   ;;  %415 = vperm.xlu1 %780, %v412_v10   ;;  %v328_v13 = vld [vmem:[%s1155_s1] sm:$0x3]  ;;  %v481_v21 = vld [vmem:[#allocation7 + $0x1e0] sm:$0xff]  ;;  %v450_v22 = vld [vmem:[#allocation7 + $0xe8] sm:$0xff]  ;;  %s857_s25 = scalar_lea.hbm %s856_s21, 64  ;;  %s861_s19 = scalar_lea.hbm %s1160_s7, 128 }
  0x37   : > { %353 = vmatpush.msra.mxu0 %v1088_v7  ;;  %373 = vmatpush.msra.mxu1 %v1090_v8  ;;  %v389_v14 = vld [vmem:[%s1157_s3] sm:$0x3]  ;;  %v482_v23 = vld [vmem:[#allocation7 + $0x1e8] sm:$0xff]  ;;  %v447_v24 = vld [vmem:[#allocation7 + $0xd0] sm:$0xff]  ;;  %p858_p1 = scmp.ne.s32.totalorder %s856_s21, %s857_s25  ;;  %p862_p11 = scmp.lt.s32.totalorder %s856_s21, %s1160_s7 }
  0x38   : > { %v452_v18 = vld [vmem:[#allocation7 + $0xf8] sm:$0xff]  ;;  %492 = vmatpush.msra.mxu2 %v451_v16  ;;  %512 = vmatpush.msra.mxu3 %v483_v17  ;;  %v479_v25 = vld [vmem:[#allocation7 + $0x1d0] sm:$0xff]  ;;  %v445_v28 = vld [vmem:[#allocation7 + $0xc0] sm:$0xff]  ;;  %p863_p9 = scmp.lt.s32.totalorder %s861_s19, %s857_s25 }
  0x39   : > { %354 = vmatpush.msra.mxu0 %v1097_v11  ;;  %374 = vmatpush.msra.mxu1 %v1099_v12  ;;  %v484_v19 = vld [vmem:[#allocation7 + $0x1f8] sm:$0xff]  ;;  %v477_v29 = vld [vmem:[#allocation7 + $0x1c0] sm:$0xff]  ;;  %v446_v30 = vld [vmem:[#allocation7 + $0xc8] sm:$0xff]  ;;  %p859_p4 = pnand %p858_p1, %p1034_p3 }
  0x3a   : > { %708 = vmatmul.msk.f32.vlgmr.msra.gmra.mxu0 %vm335_vm0, %v328_v13  ;;  %709 = vmatmul.msk.f32.vlgmr.msra.gmra.mxu1 %vm335_vm0, %v328_v13  ;;  %v448_v26 = vld [vmem:[#allocation7 + $0xd8] sm:$0xff]  ;;  %v478_v31 = vld [vmem:[#allocation7 + $0x1c8] sm:$0xff]  ;;  %v443_v32 = vld [vmem:[#allocation7 + $0xb0] sm:$0xff]  ;;  %p864_p2 = por %p863_p9, %p862_p11 }
  0x3b   : > { %532 = vmatpush.msrb.mxu0 %v452_v18  ;;  %552 = vmatpush.msrb.mxu1 %v484_v19  ;;  %v480_v27 = vld [vmem:[#allocation7 + $0x1d8] sm:$0xff]  ;;  %v475_v33 = vld [vmem:[#allocation7 + $0x1b0] sm:$0xff]  ;;  %v441_v36 = vld [vmem:[#allocation7 + $0xa0] sm:$0xff]  ;;  %p860_p8 = pneg %p859_p4 }
  0x3c   : > { %493 = vmatpush.msra.mxu2 %v449_v20  ;;  %513 = vmatpush.msra.mxu3 %v481_v21  ;;  %v444_v34 = vld [vmem:[#allocation7 + $0xb8] sm:$0xff]  ;;  %v473_v37 = vld [vmem:[#allocation7 + $0x1a0] sm:$0xff]  ;;  %v442_v38 = vld [vmem:[#allocation7 + $0xa8] sm:$0xff] }
  0x3d   : > { %533 = vmatpush.msrb.mxu0 %v450_v22  ;;  %553 = vmatpush.msrb.mxu1 %v482_v23  ;;  %v476_v35 = vld [vmem:[#allocation7 + $0x1b8] sm:$0xff]  ;;  %v474_v39 = vld [vmem:[#allocation7 + $0x1a8] sm:$0xff]  ;;  %v439_v40 = vld [vmem:[#allocation7 + $0x90] sm:$0xff]  ;;  %p865_p10 = pnand %p864_p2, %p860_p8 }
  0x3e   : > { %392 = vperm.xlu0 %779, %v389_v14   ;;  %488 = vperm.xlu1 %780, %v485_v15   ;;  %v471_v41 = vld [vmem:[#allocation7 + $0x190] sm:$0xff]  ;;  %v440_v42 = vld [vmem:[#allocation7 + $0x98] sm:$0xff]  ;;  %v437_v44 = vld [vmem:[#allocation7 + $0x80] sm:$0xff] }
  0x3f   : > { %494 = vmatpush.msra.mxu2 %v447_v24  ;;  %514 = vmatpush.msra.mxu3 %v479_v25  ;;  %v472_v43 = vld [vmem:[#allocation7 + $0x198] sm:$0xff]  ;;  %v469_v45 = vld [vmem:[#allocation7 + $0x180] sm:$0xff]  ;;  %v438_v46 = vld [vmem:[#allocation7 + $0x88] sm:$0xff] }
  0x40   : > { %534 = vmatpush.msrb.mxu0 %v448_v26  ;;  %554 = vmatpush.msrb.mxu1 %v480_v27  ;;  %v470_v47 = vld [vmem:[#allocation7 + $0x188] sm:$0xff]  ;;  %v435_v48 = vld [vmem:[#allocation7 + $0x70] sm:$0xff]  ;;  %v436_v50 = vld [vmem:[#allocation7 + $0x78] sm:$0xff] }
  0x41   : > { %495 = vmatpush.msra.mxu2 %v445_v28  ;;  %515 = vmatpush.msra.mxu3 %v477_v29  ;;  %v467_v49 = vld [vmem:[#allocation7 + $0x170] sm:$0xff]  ;;  %v468_v51 = vld [vmem:[#allocation7 + $0x178] sm:$0xff]  ;;  %v433_v52 = vld [vmem:[#allocation7 + $0x60] sm:$0xff] }
  0x42   : > { %535 = vmatpush.msrb.mxu0 %v446_v30  ;;  %555 = vmatpush.msrb.mxu1 %v478_v31  ;;  %v465_v53 = vld [vmem:[#allocation7 + $0x160] sm:$0xff]  ;;  %v434_v54 = vld [vmem:[#allocation7 + $0x68] sm:$0xff]  ;;  %v431_v56 = vld [vmem:[#allocation7 + $0x50] sm:$0xff] }
  0x43   : > { %496 = vmatpush.msra.mxu2 %v443_v32  ;;  %516 = vmatpush.msra.mxu3 %v475_v33  ;;  %v466_v55 = vld [vmem:[#allocation7 + $0x168] sm:$0xff]  ;;  %v463_v57 = vld [vmem:[#allocation7 + $0x150] sm:$0xff]  ;;  %v432_v58 = vld [vmem:[#allocation7 + $0x58] sm:$0xff] }
  0x44   : > { %536 = vmatpush.msrb.mxu0 %v444_v34  ;;  %556 = vmatpush.msrb.mxu1 %v476_v35  ;;  %v464_v59 = vld [vmem:[#allocation7 + $0x158] sm:$0xff]  ;;  %v429_v60 = vld [vmem:[#allocation7 + $0x40] sm:$0xff]  ;;  %v430_v62 = vld [vmem:[#allocation7 + $0x48] sm:$0xff] }
  0x45   : > { %497 = vmatpush.msra.mxu2 %v441_v36  ;;  %517 = vmatpush.msra.mxu3 %v473_v37  ;;  %v461_v61 = vld [vmem:[#allocation7 + $0x140] sm:$0xff]  ;;  %v462_v63 = vld [vmem:[#allocation7 + $0x148] sm:$0xff]  ;;  %v427_v0 = vld [vmem:[#allocation7 + $0x30] sm:$0xff] }
  0x46   : > { %537 = vmatpush.msrb.mxu0 %v442_v38  ;;  %557 = vmatpush.msrb.mxu1 %v474_v39  ;;  %v459_v1 = vld [vmem:[#allocation7 + $0x130] sm:$0xff]  ;;  %v428_v2 = vld [vmem:[#allocation7 + $0x38] sm:$0xff]  ;;  %v425_v10 = vld [vmem:[#allocation7 + $0x20] sm:$0xff] }
  0x47   : > { %498 = vmatpush.msra.mxu2 %v439_v40  ;;  %518 = vmatpush.msra.mxu3 %v471_v41  ;;  %v460_v9 = vld [vmem:[#allocation7 + $0x138] sm:$0xff]  ;;  %v457_v13 = vld [vmem:[#allocation7 + $0x120] sm:$0xff]  ;;  %v426_v14 = vld [vmem:[#allocation7 + $0x28] sm:$0xff] }
  0x48   : > { %538 = vmatpush.msrb.mxu0 %v440_v42  ;;  %558 = vmatpush.msrb.mxu1 %v472_v43  ;;  %v458_v15 = vld [vmem:[#allocation7 + $0x128] sm:$0xff]  ;;  %v423_v16 = vld [vmem:[#allocation7 + $0x10] sm:$0xff]  ;;  %v424_v18 = vld [vmem:[#allocation7 + $0x18] sm:$0xff] }
  0x49   : > { %499 = vmatpush.msra.mxu2 %v437_v44  ;;  %519 = vmatpush.msra.mxu3 %v469_v45  ;;  %v455_v17 = vld [vmem:[#allocation7 + $0x110] sm:$0xff]  ;;  %v456_v19 = vld [vmem:[#allocation7 + $0x118] sm:$0xff]  ;;  %v421_v20 = vld [vmem:[#allocation7] sm:$0xff] }
  0x4a   : > { %539 = vmatpush.msrb.mxu0 %v438_v46  ;;  %559 = vmatpush.msrb.mxu1 %v470_v47  ;;  %v453_v21 = vld [vmem:[#allocation7 + $0x100] sm:$0xff]  ;;  %v422_v22 = vld [vmem:[#allocation7 + $0x8] sm:$0xff] }
  0x4b   : > { %500 = vmatpush.msra.mxu2 %v435_v48  ;;  %520 = vmatpush.msra.mxu3 %v467_v49  ;;  %v454_v23 = vld [vmem:[#allocation7 + $0x108] sm:$0xff] }
  0x4c   : > { %540 = vmatpush.msrb.mxu0 %v436_v50  ;;  %560 = vmatpush.msrb.mxu1 %v468_v51 }
  0x4d   : > { %501 = vmatpush.msra.mxu2 %v433_v52  ;;  %521 = vmatpush.msra.mxu3 %v465_v53 }
  0x4e   : > { %541 = vmatpush.msrb.mxu0 %v434_v54  ;;  %561 = vmatpush.msrb.mxu1 %v466_v55 }
  0x4f   : > { %502 = vmatpush.msra.mxu2 %v431_v56  ;;  %522 = vmatpush.msra.mxu3 %v463_v57 }
  0x50   : > { %542 = vmatpush.msrb.mxu0 %v432_v58  ;;  %562 = vmatpush.msrb.mxu1 %v464_v59 }
  0x51   : > { %503 = vmatpush.msra.mxu2 %v429_v60  ;;  %523 = vmatpush.msra.mxu3 %v461_v61 }
  0x52   : > { %543 = vmatpush.msrb.mxu0 %v430_v62  ;;  %563 = vmatpush.msrb.mxu1 %v462_v63 }
  0x53   : > { %504 = vmatpush.msra.mxu2 %v427_v0  ;;  %524 = vmatpush.msra.mxu3 %v459_v1 }
  0x54   : > { %544 = vmatpush.msrb.mxu0 %v428_v2  ;;  %564 = vmatpush.msrb.mxu1 %v460_v9 }
  0x55   : > { %505 = vmatpush.msra.mxu2 %v425_v10  ;;  %525 = vmatpush.msra.mxu3 %v457_v13 }
  0x56   : > { %545 = vmatpush.msrb.mxu0 %v426_v14  ;;  %565 = vmatpush.msrb.mxu1 %v458_v15 }
  0x57   : > { %506 = vmatpush.msra.mxu2 %v423_v16  ;;  %526 = vmatpush.msra.mxu3 %v455_v17 }
  0x58   : > { %546 = vmatpush.msrb.mxu0 %v424_v18  ;;  %566 = vmatpush.msrb.mxu1 %v456_v19 }
  0x59   : > { %507 = vmatpush.msra.mxu2 %v421_v20  ;;  %527 = vmatpush.msra.mxu3 %v453_v21 }
  0x5a   : > { %547 = vmatpush.msrb.mxu0 %v422_v22  ;;  %567 = vmatpush.msrb.mxu1 %v454_v23 }
  0xa8   : > { %v333_v24 = vpop.permute.xlu0 %332  ;;  %v416_v52 = vpop.permute.xlu1 %415 }
  0xa9   : > { %v418_v53 = vperm.slane %v416_v52, 0 }
  0xb0   : > { %v393_v39 = vpop.permute.xlu0 %392  ;;  %v489_v60 = vpop.permute.xlu1 %488 }
  0xb1   : > { %v491_v61 = vperm.slane %v489_v60, 0 }
  0xb7   : > { %v356_v25 = vpop.f32.mrf.mxu0  ;;  %v376_v26 = vpop.f32.mrf.mxu1 }
  0xb8   : > { %v357_v27 = vadd.f32 %v356_v25, %v333_v24  ;;  %v377_v28 = vadd.f32 %v376_v26, %v333_v24 }
  0xba   : > { %v379_v29 = vadd.f32 3.0, %v357_v27  ;;  %v380_v30 = vadd.f32 3.0, %v377_v28 }
  0xbc   : > { %v381_v31 = vmax.f32 %v379_v29, 0.0  ;;  %v382_v32 = vmax.f32 %v380_v30, 0.0 }
  0xbe   : > { %v383_v33 = vmin.f32 %v381_v31, 6.0  ;;  %v384_v34 = vmin.f32 %v382_v32, 6.0 }
  0xc0   : > { %v385_v35 = vmul.f32 %v383_v33, %v357_v27  ;;  %v386_v36 = vmul.f32 %v384_v34, %v377_v28 }
  0xc2   : > { %v387_v37 = vmul.f32 0.16666667, %v385_v35  ;;  %v388_v38 = vmul.f32 0.16666667, %v386_v36 }
  0xc4   : > { %v395_v40 = vmul.f32 %v393_v39, %v387_v37  ;;  %v396_v41 = vmul.f32 %v393_v39, %v388_v38 }
  0xc6   : > { %v398_v42 = vsel %vm397_vm1, %v395_v40, 0.0  ;;  %v405_v43 = vsel %vm397_vm1, %v396_v41, 0.0 }
  0xc7   : > { %v399_v44 = vrot.slane %v398_v42, 4  ;;  %v406_v45 = vrot.slane %v405_v43, 4 }
  0xc9   : > { %v400_v46 = vadd.f32 %v399_v44, %v398_v42  ;;  %v407_v47 = vadd.f32 %v406_v45, %v405_v43 }
  0xcb   : > { %v401_v48 = vrot.slane %v400_v46, 2  ;;  %v408_v49 = vrot.slane %v407_v47, 2 }
  0xcd   : > { %v402_v50 = vadd.f32 %v401_v48, %v400_v46  ;;  %v409_v51 = vadd.f32 %v408_v49, %v407_v47 }
  0xcf   : > { %v403_v54 = vrot.slane %v402_v50, 1  ;;  %v410_v55 = vrot.slane %v409_v51, 1 }
  0xd1   : > { %v404_v56 = vadd.f32 %v403_v54, %v402_v50  ;;  %v411_v57 = vadd.f32 %v410_v55, %v409_v51 }
  0xd3   : > { %v419_v58 = vadd.f32 %v418_v53, %v404_v56  ;;  %v420_v59 = vadd.f32 %v418_v53, %v411_v57 }
  0xd5   : > { %508 = vmatmul.f32.vlgmr.msra.gmra.mxu2 %v419_v58  ;;  %528 = vmatmul.f32.vlgmr.msra.gmra.mxu3 %v420_v59 }
  0xd6   : > { %548 = vmatmul.f32.vlgmr.msrb.gmra.mxu0 %v419_v58  ;;  %568 = vmatmul.f32.vlgmr.msrb.gmra.mxu1 %v420_v59 }
 0x153   : > { %v549_v62 = vpop.f32.mrf.mxu0  ;;  %v569_v0 = vpop.f32.mrf.mxu1 }
 0x154   : > { %v550_v63 = vadd.f32 %v549_v62, %v491_v61 }
 0x156   : > { %v570_v1 = vadd.f32 %v569_v0, %v550_v63 }
 0x158   : > { %v573_v2 = vadd.f32 3.0, %v570_v1  ;;  %v509_v9 = vpop.f32.mrf.mxu2  ;;  %v529_v14 = vpop.f32.mrf.mxu3 }
 0x159   : > { %v510_v10 = vadd.f32 %v509_v9, %v491_v61 }
 0x15a   : > { %v575_v13 = vmax.f32 %v573_v2, 0.0 }
 0x15b   : > { %v530_v15 = vadd.f32 %v529_v14, %v510_v10 }
 0x15c   : > { %v577_v16 = vmin.f32 %v575_v13, 6.0 }
 0x15d   : > { %v572_v17 = vadd.f32 3.0, %v530_v15 }
 0x15e   : > { %v579_v18 = vmul.f32 0.16666667, %v577_v16 }
 0x15f   : > { %v574_v19 = vmax.f32 %v572_v17, 0.0 }
 0x160   : > { %v581_v20 = vperm.slane %v579_v18, 0 }
 0x161   : > { %v576_v21 = vmin.f32 %v574_v19, 6.0 }
 0x162   : > { %v583_v22 = vmul.f32 %v581_v20, %v1099_v12  ;;  %v585_v23 = vmul.f32 %v581_v20, %v1090_v8  ;;  %v587_v24 = vmul.f32 %v581_v20, %v1086_v6  ;;  %v589_v25 = vmul.f32 %v581_v20, %v1080_v4 }
 0x163   : > { %v578_v26 = vmul.f32 0.16666667, %v576_v21 }
 0x164   : > { %591 = vst [vmem:[%s319_s11 + $0x8] sm:$0xff] %v583_v22 }
 0x165   : > { %593 = vst [vmem:[%s319_s11 + $0x18] sm:$0xff] %v585_v23  ;;  %v580_v27 = vperm.slane %v578_v26, 0 }
 0x166   : > { %595 = vst [vmem:[%s319_s11 + $0x28] sm:$0xff] %v587_v24 }
 0x167   : > { %597 = vst [vmem:[%s319_s11 + $0x38] sm:$0xff] %v589_v25  ;;  %v582_v6 = vmul.f32 %v580_v27, %v1097_v11  ;;  %v584_v4 = vmul.f32 %v580_v27, %v1088_v7  ;;  %v586_v8 = vmul.f32 %v580_v27, %v1082_v5  ;;  %v588_v12 = vmul.f32 %v580_v27, %v1078_v3 }
 0x169   : > { %590 = vst [vmem:[%s319_s11] sm:$0xff] %v582_v6 }
 0x16a   : > { %592 = vst [vmem:[%s319_s11 + $0x10] sm:$0xff] %v584_v4 }
 0x16b   : > { %594 = vst [vmem:[%s319_s11 + $0x20] sm:$0xff] %v586_v8 }
 0x16c   : > { %596 = vst [vmem:[%s319_s11 + $0x30] sm:$0xff] %v588_v12 }
 0x16d   : > { %868 = shalt.err (!%p865_p10)
}
 0x16e   : > { %s917_s13 = smov 256   ;;  %s918_s16 = smov 16  }
 0x16f   : > { %723 = dma.vmem_to_hbm [thread:$0]  (%p1034_p3), %s612_s4, 1024, %s614_s24, %s599_s18, %s917_s13, %s917_s13, %s918_s16  }
 0x170 PF: > { %s628_s20 = sand.u32 1, %s899_s28   ;;  %p1169_p12 = scmp.ge.s32.totalorder %s911_s8, 2 }
 0x171   : > { %s629_s27 = scalar_lea.sflag [#allocation6], %s628_s20 }
 0x172   : > { %p734_p13 = pnand %p1169_p12, %p1000_p6 }
 0x174   : > { %p735_p0 = pneg %p734_p13 }
 0x176   : > { %894 = dma.done.wait (%p735_p0), %s629_s27, 1024  }
 0x177   : > { %896 = vsyncadd (%p735_p0), %s629_s27, 4294966272  ;;  %p25_p5 = scmp.ge.s32.totalorder %s1018_s17, 4   ;;  %s1170_s28 = smov %s903_s29 }
 0x178   : > { %s1171_s29 = smov %s907_s30  ;;  %s1172_s30 = smov %s1030_s22 }
 0x179   : > { %s1173_s8 = smov %s1018_s17  ;;  %27 = sbr.rel (!%p25_p5) target bundleno = 10 (0xa), region = 97 }
 0x17e   :  { %635 = vsyncpa [#allocation5], 1 }
 0x17f   :  { %637 = vsyncpa [#allocation5 + $0x1], 1 }
 0x180   :  { %638 = vsyncpa [#allocation8], 1 }
 0x181   :  { %639 = vsyncpa [#allocation6], 1 }
 0x182   :  { %641 = vsyncpa [#allocation6 + $0x1], 1 }

</bundles_post_ra>
